<compile_context>
chip_gen: v7x
topology: tpu7x:2x2x1
jax: 0.10.0
libtpu: 0.0.40
codegen_flags: <defaults>
</compile_context>

<pallas_src>
import jax
import jax.numpy as jnp
from jax import lax
from jax.experimental import pallas as pl
from jax.experimental.pallas import tpu as pltpu

# "opt" hyperparameters (synthetic, deterministic)
BIT = 32        # opt.bit
LABEL_DIM = 16  # opt.label_dim

TILE_B_MAX = 8192  # >=1us of DMA per grid step; ~2.5 MiB double-buffered VMEM


def _round_up(n, m):
    return ((n + m - 1) // m) * m


def labelnet_kernel(x_ref, w_ref, ot_ref):
    # x_ref:  (tile_b, LABEL_DIM)  bf16
    # w_ref:  (BIT, LABEL_DIM)     bf16  (VMEM-resident across the grid)
    # ot_ref: (BIT, tile_b)        f32   (lane-dense: tile_b is a multiple of 128)
    ot_ref[...] = lax.dot_general(
        w_ref[...], x_ref[...],
        dimension_numbers=(((1,), (1,)), ((), ())),   # contract label_dim of both
        preferred_element_type=jnp.float32,
    ).astype(ot_ref.dtype)


def labelnet_forward(inputs, conv_weight):
    """inputs: any shape (B, ...) flattening to (B, LABEL_DIM).
    conv_weight: (BIT, 1, 1, LABEL_DIM)  -- the Conv2d weight."""
    B = inputs.shape[0]
    L = LABEL_DIM

    x = inputs.reshape(B, -1).astype(jnp.bfloat16)          # (B, L)
    w = conv_weight.reshape(BIT, L).astype(jnp.bfloat16)    # (BIT, L), no transpose

    # Batch tile: multiple of 128 (lane-dense output), capped at TILE_B_MAX.
    tile_b = min(TILE_B_MAX, _round_up(B, 128))
    b_pad = _round_up(B, tile_b)
    if b_pad != B:
        x = jnp.pad(x, ((0, b_pad - B), (0, 0)))

    grid = (b_pad // tile_b,)

    cost = pl.CostEstimate(
        flops=2 * b_pad * L * BIT,
        transcendentals=0,
        bytes_accessed=b_pad * L * 2 + BIT * L * 2 + b_pad * BIT * 4,
    )

    out_t = pl.pallas_call(
        labelnet_kernel,
        out_shape=jax.ShapeDtypeStruct((BIT, b_pad), jnp.float32),
        grid=grid,
        in_specs=[
            pl.BlockSpec((tile_b, L), lambda i: (i, 0)),   # batch tile of x
            pl.BlockSpec((BIT, L), lambda i: (0, 0)),      # weight stays resident
        ],
        out_specs=pl.BlockSpec((BIT, tile_b), lambda i: (0, i)),  # lane-dense out^T
        compiler_params=pltpu.CompilerParams(
            dimension_semantics=("parallel",),             # v7x: shard batch over 2 TCs
        ),
        cost_estimate=cost,
    )(x, w)

    out = out_t.T[:B]           # (B, BIT) f32, drop batch padding
    # torch.squeeze: drops all size-1 dims of (B, BIT, 1, 1) -> (B, BIT) for B > 1,
    # and (BIT,) for B == 1 (matching PyTorch exactly).
    return jnp.squeeze(out)


def init_labelnet_params(key):
    # nn.init.normal_(weight, std=0.01); Conv2d(1, BIT, (1, LABEL_DIM), bias=False)
    return 0.01 * jax.random.normal(key, (BIT, 1, 1, LABEL_DIM), dtype=jnp.float32)


if __name__ == "__main__":
    key = jax.random.PRNGKey(0)
    k_w, k_x = jax.random.split(key)

    conv_weight = init_labelnet_params(k_w)

    # Small batch of "label" inputs; forward views them as (B, 1, 1, LABEL_DIM).
    B = 4
    inputs = jax.random.normal(k_x, (B, LABEL_DIM), dtype=jnp.float32)

    out = labelnet_forward(inputs, conv_weight)
    out = jax.block_until_ready(out)
    assert out.shape == (B, BIT)

    # Reference 1: same bf16-input math in plain JAX (tight check of the kernel).
    x_bf = inputs.reshape(B, -1).astype(jnp.bfloat16).astype(jnp.float32)
    w_bf = conv_weight.reshape(BIT, LABEL_DIM).astype(jnp.bfloat16).astype(jnp.float32)
    ref_bf = x_bf @ w_bf.T
    assert jnp.allclose(out, ref_bf, atol=1e-5, rtol=1e-4)

    # Reference 2: full-precision PyTorch-equivalent conv (loose check for the bf16 cast).
    ref_f32 = inputs.reshape(B, -1) @ conv_weight.reshape(BIT, LABEL_DIM).T
    assert jnp.allclose(out, ref_f32, atol=1e-3, rtol=5e-2)

    print("KERNEL_OK")
</pallas_src>

<mosaic_0001>
module attributes {stable_mosaic.version = 11 : i64} {
  func.func @labelnet_kernel(%arg0: i32, %arg1: memref<128x16xbf16, #tpu.memory_space<vmem>>, %arg2: memref<32x16xbf16, #tpu.memory_space<vmem>>, %arg3: memref<32x128xf32, #tpu.memory_space<vmem>>) attributes {dimension_semantics = [#tpu.dimension_semantics<parallel>], iteration_bounds = array<i64: 1>, scalar_prefetch = 0 : i64, scratch_operands = 0 : i64, tpu.core_type = #tpu.core_type<tc>, window_params = [{transform_indices = @transform_0, window_bounds = array<i64: 128, 16>}, {pipeline_mode = #tpu.pipeline_mode<synchronous>, transform_indices = @transform_1, window_bounds = array<i64: 32, 16>}, {transform_indices = @transform_2, window_bounds = array<i64: 32, 128>}]} {
    %c0 = arith.constant 0 : index
    %c0_0 = arith.constant 0 : index
    %0 = vector.load %arg2[%c0, %c0_0] : memref<32x16xbf16, #tpu.memory_space<vmem>>, vector<32x16xbf16>
    %c0_1 = arith.constant 0 : index
    %c0_2 = arith.constant 0 : index
    %1 = vector.load %arg1[%c0_1, %c0_2] : memref<128x16xbf16, #tpu.memory_space<vmem>>, vector<128x16xbf16>
    %cst = arith.constant dense<0.000000e+00> : vector<32x128xf32>
    %2 = tpu.matmul %0, %1, %cst {dimension_numbers = #tpu.dot_dimension_numbers<[1], [1], [0], [0], [0, 0, 1, 0], [], []>} : vector<32x16xbf16>, vector<128x16xbf16>, vector<32x128xf32> -> vector<32x128xf32>
    %c0_3 = arith.constant 0 : index
    %c0_4 = arith.constant 0 : index
    %3 = vector.load %arg3[%c0_3, %c0_4] : memref<32x128xf32, #tpu.memory_space<vmem>>, vector<32x128xf32>
    tpu.vector_store %arg3[%c0_3, %c0_4], %2 {strides = array<i32>} : memref<32x128xf32, #tpu.memory_space<vmem>>, vector<32x128xf32>,
    return
  }
  func.func @transform_0(%arg0: i32) -> (i32, i32) {
    %c0_i32 = arith.constant 0 : i32
    %c0_i32_0 = arith.constant 0 : i32
    return %arg0, %c0_i32 : i32, i32
  }
  func.func @transform_1(%arg0: i32) -> (i32, i32) {
    %c0_i32 = arith.constant 0 : i32
    %c0_i32_0 = arith.constant 0 : i32
    %c0_i32_1 = arith.constant 0 : i32
    return %c0_i32, %c0_i32_0 : i32, i32
  }
  func.func @transform_2(%arg0: i32) -> (i32, i32) {
    %c0_i32 = arith.constant 0 : i32
    %c0_i32_0 = arith.constant 0 : i32
    return %c0_i32, %arg0 : i32, i32
  }
}

</mosaic_0001>

<bundles_post_ra>
// kernel: tpu_custom_call.1
= control target key start
LH: loop header
LB: loop body
LE: loop exit
PB: predicated region body
PF: predicated region fallthrough
CT: control target
= control target key end

     0   :  { %vm83_vm0 = vcmask 130048   ;;  %s348_s0 = inlined_call_operand.vmem [shape: bf16[128,16], index: 0, kind: input, shape index: {}]   ;;  %s349_s1 = inlined_call_operand.vmem [shape: bf16[32,16], index: 1, kind: input, shape index: {}]   ;;  %s350_s2 = inlined_call_operand.hbm [shape: f32[32,128], index: 2, kind: output, shape index: {}]  }
   0x1   :  { %v236_v0 = vld [vmem:[%s348_s0] sm:$0xff]   ;;  %v237_v1 = vld [vmem:[%s348_s0 + $0x8] sm:$0xff]   ;;  %v238_v3 = vld [vmem:[%s348_s0 + $0x10] sm:$0xff]  }
   0x2   :  { %225 = vmatprep.subr.msk.bf16.mxu0 %vm83_vm0, %v236_v0  ;;  %v91_v2 = vsel %vm83_vm0, %v236_v0, 0  ;;  %v94_v4 = vsel %vm83_vm0, %v237_v1, 0  ;;  %v244_v5 = vld [vmem:[%s349_s1] sm:$0xff]  }
   0x3   :  { %206 = vmatpush3.bf16.xpose.msra.mxu0 %v91_v2  ;;  %221 = vmatprep.mubr.msk.bf16.mxu0 %vm83_vm0, %v244_v5 }
   0x4   :  { %226 = vmatprep.subr.msk.bf16.mxu0 %vm83_vm0, %v237_v1 }
   0x5   :  { %7 = vsyncpa [#allocation3], 0  ;;  %v97_v6 = vsel %vm83_vm0, %v238_v3, 0  ;;  %v239_v7 = vld [vmem:[%s348_s0 + $0x18] sm:$0xff]   ;;  %v240_v9 = vld [vmem:[%s348_s0 + $0x20] sm:$0xff]   ;;  %s270_s29 = smov [#allocation2]  }
   0x6   :  { %v100_v8 = vsel %vm83_vm0, %v239_v7, 0  ;;  %v103_v10 = vsel %vm83_vm0, %v240_v9, 0  ;;  %v241_v11 = vld [vmem:[%s348_s0 + $0x28] sm:$0xff]   ;;  %v242_v13 = vld [vmem:[%s348_s0 + $0x30] sm:$0xff]   ;;  %v243_v15 = vld [vmem:[%s348_s0 + $0x38] sm:$0xff]   ;;  %s172_s30 = sshll.u32 %s270_s29, 4  ;;  %s173_s30 = int_to_ptr.vmem [resolvable:$true] %s172_s30 }
   0x7   :  { %v106_v12 = vsel %vm83_vm0, %v241_v11, 0  ;;  %v109_v14 = vsel %vm83_vm0, %v242_v13, 0  ;;  %v112_v16 = vsel %vm83_vm0, %v243_v15, 0  ;;  %v245_v17 = vld [vmem:[%s349_s1 + $0x8] sm:$0xff]   ;;  %s246_s0 = scalar_lea.vmem %s173_s30, 512  ;;  %p251_p1 = scmp.lt.s32.totalorder %s173_s30, %s173_s30 }
   0x8   :  { %p247_p0 = scmp.ne.s32.totalorder %s173_s30, %s246_s0  ;;  %p252_p2 = scmp.lt.s32.totalorder %s246_s0, %s246_s0 }
   0xa   :  { %p253_p3 = por %p252_p2, %p251_p1 }
   0xb   :  { %208 = vmatpush3.bf16.xpose.msra.mxu0 %v94_v4 }
   0xc   :  { %227 = vmatprep.subr.msk.bf16.mxu0 %vm83_vm0, %v238_v3  ;;  %p254_p4 = pnand %p253_p3, %p247_p0 }
  0x13   :  { %210 = vmatpush3.bf16.xpose.msra.mxu0 %v97_v6 }
  0x14   :  { %228 = vmatprep.subr.msk.bf16.mxu0 %vm83_vm0, %v239_v7 }
  0x1b   :  { %212 = vmatpush3.bf16.xpose.msra.mxu0 %v100_v8 }
  0x1c   :  { %229 = vmatprep.subr.msk.bf16.mxu0 %vm83_vm0, %v240_v9 }
  0x23   :  { %214 = vmatpush3.bf16.xpose.msra.mxu0 %v103_v10 }
  0x24   :  { %230 = vmatprep.subr.msk.bf16.mxu0 %vm83_vm0, %v241_v11 }
  0x2b   :  { %216 = vmatpush3.bf16.xpose.msra.mxu0 %v106_v12 }
  0x2c   :  { %231 = vmatprep.subr.msk.bf16.mxu0 %vm83_vm0, %v242_v13 }
  0x33   :  { %218 = vmatpush3.bf16.xpose.msra.mxu0 %v109_v14 }
  0x34   :  { %232 = vmatprep.subr.msk.bf16.mxu0 %vm83_vm0, %v243_v15 }
  0x3b   :  { %220 = vmatpush3.bf16.xpose.msra.mxu0 %v112_v16 }
  0x42   :  { %222 = vmatmul.mubr.msk.bf16.vlgmr.msra.gmra.mrb[0].mxu0 %vm83_vm0, %v245_v17 }
 0x115   :  { %v223_v18 = vpop.f32.mrb[0].mxu0 }
 0x116   :  { %165 = vst [vmem:[#allocation2 + $0x10] sm:$0xff] %v223_v18  ;;  %v148_v19 = vpop.f32.mrb[1].mxu0 }
 0x117   :  { %163 = vst [vmem:[#allocation2] sm:$0xff] %v148_v19  ;;  %v224_v20 = vpop.f32.mrb[2].mxu0 }
 0x118   :  { %166 = vst [vmem:[#allocation2 + $0x18] sm:$0xff] %v224_v20  ;;  %v151_v21 = vpop.f32.mrb[3].mxu0 }
 0x119   :  { %164 = vst [vmem:[#allocation2 + $0x8] sm:$0xff] %v151_v21 }
 0x11a   :  { %257 = shalt.err (!%p254_p4)
}
 0x11b   :  { %s258_s4 = scalar_lea.hbm %s350_s2, 512 }
 0x11c   :  { %p259_p5 = scmp.ne.s32.totalorder %s350_s2, %s258_s4  ;;  %p262_p6 = scmp.lt.u32.totalorder %s258_s4, %s350_s2 }
 0x11e   :  { %p264_p7 = pnand %p262_p6, %p259_p5 }
 0x120   :  { %267 = shalt.err (!%p264_p7)
}
 0x121   :  { %s271_s9 = smov 128   ;;  %s272_s10 = smov 8  }
 0x122   :  { %178 = dma.vmem_to_hbm [thread:$0]  %s173_s30, 512, %s350_s2, [#allocation3], %s271_s9, %s271_s9, %s272_s10  }
 0x123   :  { %268 = dma.done.wait [#allocation3], 512  }
 0x124   :  { %269 = vsyncadd [#allocation3], 4294966784 }
 0x125   :  { %182 = vsyncpa [#allocation3], 1 }

</bundles_post_ra>
